<compile_context>
chip_gen: v5e
topology: v5e:2x2
jax: 0.10.0
libtpu: 0.0.40
codegen_flags: <defaults>
</compile_context>

<pallas_src>
import functools

import jax
import jax.numpy as jnp
from jax import lax
from jax.experimental import pallas as pl
from jax.experimental.pallas import tpu as pltpu

_NEG_INF = -1e30               # Python float -> jaxpr literal, NOT a captured const
_TARGET_TILE_BYTES = 4 << 20   # ~4 MiB per K/V buffer (Pallas double-buffers it)


def _attention_kernel(q_ref, kv_ref, logits_ref, out_ref, m_sc, l_sc,
                      *, n_tokens, tile_n, needs_mask):
    """Grid axis 0 streams K/V tiles; online softmax accumulates the weighted output."""
    t = pl.program_id(0)

    @pl.when(t == 0)
    def _init():
        m_sc[...] = jnp.full_like(m_sc, _NEG_INF)
        l_sc[...] = jnp.zeros_like(l_sc)
        out_ref[...] = jnp.zeros_like(out_ref)

    kv = kv_ref[...]                                  # [tile_n, d_model]
    q = q_ref[...].astype(kv.dtype)                   # [1, d_model] (scale pre-folded)

    # s = q @ kv^T via contraction on the last dims (no transposed copy / XLU pass).
    s = lax.dot_general(q, kv,
                        dimension_numbers=(((1,), (1,)), ((), ())),
                        preferred_element_type=jnp.float32)        # [1, tile_n]

    if needs_mask:
        # Emitted only when n_tokens % tile_n != 0 (static).  The out-of-bounds
        # rows of the partial last block contain unspecified VMEM data, so mask
        # the logits AND zero the invalid K/V rows (guards 0 * NaN in e @ kv).
        col = t * tile_n + lax.broadcasted_iota(jnp.int32, (1, tile_n), 1)
        s = jnp.where(col < n_tokens, s, _NEG_INF)
        row = t * tile_n + lax.broadcasted_iota(jnp.int32, (tile_n, 1), 0)
        kv = jnp.where(row < n_tokens, kv, 0.0).astype(kv_ref.dtype)

    # Online softmax update (f32 accumulation).
    m_prev = m_sc[...]
    m_new = jnp.maximum(m_prev, jnp.max(s, axis=-1, keepdims=True))   # (1, 1)
    alpha = jnp.exp(m_prev - m_new)                                   # (1, 1)
    e = jnp.exp(s - m_new)                                            # (1, tile_n)

    l_sc[...] = alpha * l_sc[...] + jnp.sum(e, axis=-1, keepdims=True)
    m_sc[...] = m_new

    # out_ref doubles as the f32 accumulator (resident output block across the grid).
    out_ref[...] = alpha * out_ref[...] + jnp.dot(
        e.astype(kv.dtype), kv, preferred_element_type=jnp.float32)

    # Stream the raw scaled logits for this tile (lane-dense store, written once).
    # Softmax normalization over them happens once in XLA -> no per-step O(N)
    # rescale of a resident scores buffer.
    logits_ref[...] = s

    @pl.when(t == pl.num_programs(0) - 1)
    def _finalize():
        out_ref[...] = out_ref[...] / l_sc[...]   # exact divide, (1,1) denom, once


def _pick_tile_n(n_tokens, row_bytes):
    tile_n = (_TARGET_TILE_BYTES // max(row_bytes, 1)) // 128 * 128
    tile_n = max(tile_n, 128)
    if tile_n >= n_tokens:
        return n_tokens            # single tile; block dims equal the full array dims
    return tile_n


def attention_with_token_interaction(prompt, w, b, document_tokens, *, tile_n=None):
    """prompt [1, D0], w [D0, Dm], b [1, Dm] or [Dm], document_tokens [N, Dm].

    Returns (attention_scores [1, N] f32, weighted_values [1, Dm] f32).
    document_tokens are streamed through VMEM in their own dtype (pass bf16 to
    halve the dominant HBM stream); accumulation is always f32.
    """
    n_tokens, d_model = document_tokens.shape
    itemsize = jnp.dtype(document_tokens.dtype).itemsize

    # Projection + softmax scale hoisted to XLA: tiny, keeps W/b out of VMEM and
    # off the kernel's critical path.
    scale = 1.0 / float(d_model) ** 0.5
    q = (jnp.dot(prompt.astype(jnp.float32), w.astype(jnp.float32))
         + jnp.reshape(b, (1, d_model)).astype(jnp.float32)) * scale

    if tile_n is None:
        tile_n = _pick_tile_n(n_tokens, d_model * itemsize)
    tile_n = min(tile_n, n_tokens)
    if tile_n < n_tokens and tile_n % 8 != 0:
        raise ValueError("tile_n must be a multiple of 8 when it tiles the token axis")
    grid_t = pl.cdiv(n_tokens, tile_n)
    needs_mask = (n_tokens % tile_n) != 0

    kernel = functools.partial(_attention_kernel, n_tokens=n_tokens,
                               tile_n=tile_n, needs_mask=needs_mask)

    kv_tile_bytes = tile_n * d_model * itemsize
    # Double-buffered K/V stream + streamed logits blocks + residents; cap at a
    # v7x-safe 48 MiB (64 MiB physical); v5e/v6e have more headroom anyway.
    vmem_limit = int(min(48 << 20, max(32 << 20, 3 * kv_tile_bytes + (4 << 20))))

    cost = pl.CostEstimate(
        flops=4 * n_tokens * d_model,                  # two [1,d]x[d,tile] matmuls
        transcendentals=2 * n_tokens,
        bytes_accessed=(n_tokens * d_model * itemsize  # K/V stream (dominant)
                        + n_tokens * 4                 # streamed logits
                        + 8 * d_model + 8),
    )

    logits, weighted = pl.pallas_call(
        kernel,
        out_shape=(jax.ShapeDtypeStruct((1, n_tokens), jnp.float32),
                   jax.ShapeDtypeStruct((1, d_model), jnp.float32)),
        grid_spec=pltpu.PrefetchScalarGridSpec(
            num_scalar_prefetch=0,
            grid=(grid_t,),
            in_specs=[
                pl.BlockSpec((1, d_model), lambda t: (0, 0)),        # q (resident)
                pl.BlockSpec((tile_n, d_model), lambda t: (t, 0)),   # K/V stream
            ],
            out_specs=(
                pl.BlockSpec((1, tile_n), lambda t: (0, t)),         # logits (streamed)
                pl.BlockSpec((1, d_model), lambda t: (0, 0)),        # weighted (resident)
            ),
            scratch_shapes=[
                pltpu.VMEM((1, 1), jnp.float32),   # running max m
                pltpu.VMEM((1, 1), jnp.float32),   # running denom l
            ],
        ),
        compiler_params=pltpu.CompilerParams(
            dimension_semantics=("arbitrary",),    # token axis is a reduction
            vmem_limit_bytes=vmem_limit,
        ),
        cost_estimate=cost,
    )(q, document_tokens)

    # Exact softmax over the raw logits: one cheap O(N) XLA pass (the weighted
    # output was already normalized inside the kernel via the online softmax).
    scores = jax.nn.softmax(logits, axis=-1)
    return scores, weighted


def _reference(prompt, w, b, document_tokens):
    q = prompt @ w + jnp.reshape(b, (1, -1))
    s = q @ document_tokens.T
    s = jax.nn.softmax(s / jnp.sqrt(jnp.float32(document_tokens.shape[-1])), axis=-1)
    return s, s @ document_tokens


if __name__ == "__main__":
    original_d_model = 32
    d_model = 32
    num_tokens = 8

    key = jax.random.PRNGKey(0)
    k_prompt, k_tokens, k_w, k_b, k_tokens2 = jax.random.split(key, 5)

    prompt = jax.random.normal(k_prompt, (1, original_d_model), dtype=jnp.float32)
    document_tokens = jax.random.normal(k_tokens, (num_tokens, d_model),
                                        dtype=jnp.float32)

    # Deterministic "Linear" parameters (uniform like PyTorch's default range).
    bound = 1.0 / (original_d_model ** 0.5)
    w = jax.random.uniform(k_w, (original_d_model, d_model),
                           minval=-bound, maxval=bound, dtype=jnp.float32)
    b = jax.random.uniform(k_b, (1, d_model),
                           minval=-bound, maxval=bound, dtype=jnp.float32)

    # --- Test 1: module-sized shapes, f32 K/V stream, single-tile path. ---
    scores, weighted = attention_with_token_interaction(prompt, w, b,
                                                        document_tokens)
    jax.block_until_ready((scores, weighted))
    ref_scores, ref_weighted = _reference(prompt, w, b, document_tokens)
    assert scores.shape == (1, num_tokens)
    assert weighted.shape == (1, d_model)
    assert jnp.allclose(scores, ref_scores, atol=1e-2, rtol=1e-2), (
        float(jnp.max(jnp.abs(scores - ref_scores))))
    assert jnp.allclose(weighted, ref_weighted, atol=1e-2, rtol=1e-2), (
        float(jnp.max(jnp.abs(weighted - ref_weighted))))

    # --- Test 2: multi-tile streaming, partial last tile, bf16 K/V stream. ---
    num_tokens2 = 300
    tokens2 = jax.random.normal(k_tokens2, (num_tokens2, d_model),
                                dtype=jnp.float32).astype(jnp.bfloat16)
    scores2, weighted2 = attention_with_token_interaction(prompt, w, b, tokens2,
                                                          tile_n=128)
    jax.block_until_ready((scores2, weighted2))
    ref_scores2, ref_weighted2 = _reference(prompt, w, b,
                                            tokens2.astype(jnp.float32))
    assert scores2.shape == (1, num_tokens2)
    assert weighted2.shape == (1, d_model)
    # bf16 K/V stream (q and e are downcast before the MXU, f32 accumulation).
    assert jnp.allclose(scores2, ref_scores2, atol=2e-2, rtol=2e-2), (
        float(jnp.max(jnp.abs(scores2 - ref_scores2))))
    assert jnp.allclose(weighted2, ref_weighted2, atol=2e-2, rtol=2e-2), (
        float(jnp.max(jnp.abs(weighted2 - ref_weighted2))))

    print("KERNEL_OK")
</pallas_src>

<mosaic_0001>
module attributes {stable_mosaic.version = 11 : i64} {
  func.func @_attention_kernel(%arg0: i32, %arg1: memref<1x32xf32, #tpu.memory_space<vmem>>, %arg2: memref<8x32xf32, #tpu.memory_space<vmem>>, %arg3: memref<1x8xf32, #tpu.memory_space<vmem>>, %arg4: memref<1x32xf32, #tpu.memory_space<vmem>>, %arg5: memref<1x1xf32, #tpu.memory_space<vmem>>, %arg6: memref<1x1xf32, #tpu.memory_space<vmem>>) attributes {dimension_semantics = [#tpu.dimension_semantics<arbitrary>], iteration_bounds = array<i64: 1>, scalar_prefetch = 0 : i64, scratch_operands = 2 : i64, tpu.core_type = #tpu.core_type<tc>, window_params = [{pipeline_mode = #tpu.pipeline_mode<synchronous>, transform_indices = @transform_0, window_bounds = array<i64: 1, 32>}, {transform_indices = @transform_1, window_bounds = array<i64: 8, 32>}, {transform_indices = @transform_2, window_bounds = array<i64: 1, 8>}, {pipeline_mode = #tpu.pipeline_mode<synchronous>, transform_indices = @transform_3, window_bounds = array<i64: 1, 32>}]} {
    %c0_i32 = arith.constant 0 : i32
    %0 = arith.cmpi eq, %arg0, %c0_i32 : i32
    %1 = arith.extui %0 : i1 to i32
    %c0_i32_0 = arith.constant 0 : i32
    %2 = arith.cmpi ne, %1, %c0_i32_0 : i32
    scf.if %2 {
      %cst_23 = arith.constant -1.000000e+30 : f32
      %32 = vector.broadcast %cst_23 : f32 to vector<1x1xf32>
      %c0_24 = arith.constant 0 : index
      %c0_25 = arith.constant 0 : index
      %33 = vector.load %arg5[%c0_24, %c0_25] : memref<1x1xf32, #tpu.memory_space<vmem>>, vector<1x1xf32>
      tpu.vector_store %arg5[%c0_24, %c0_25], %32 {strides = array<i32>} : memref<1x1xf32, #tpu.memory_space<vmem>>, vector<1x1xf32>,
      %cst_26 = arith.constant 0.000000e+00 : f32
      %34 = vector.broadcast %cst_26 : f32 to vector<1x1xf32>
      %c0_27 = arith.constant 0 : index
      %c0_28 = arith.constant 0 : index
      %35 = vector.load %arg6[%c0_27, %c0_28] : memref<1x1xf32, #tpu.memory_space<vmem>>, vector<1x1xf32>
      tpu.vector_store %arg6[%c0_27, %c0_28], %34 {strides = array<i32>} : memref<1x1xf32, #tpu.memory_space<vmem>>, vector<1x1xf32>,
      %cst_29 = arith.constant 0.000000e+00 : f32
      %36 = vector.broadcast %cst_29 : f32 to vector<1x32xf32>
      %c0_30 = arith.constant 0 : index
      %c0_31 = arith.constant 0 : index
      %37 = vector.load %arg4[%c0_30, %c0_31] : memref<1x32xf32, #tpu.memory_space<vmem>>, vector<1x32xf32>
      tpu.vector_store %arg4[%c0_30, %c0_31], %36 {strides = array<i32>} : memref<1x32xf32, #tpu.memory_space<vmem>>, vector<1x32xf32>,
    } else {
    }
    %c0 = arith.constant 0 : index
    %c0_1 = arith.constant 0 : index
    %3 = vector.load %arg2[%c0, %c0_1] : memref<8x32xf32, #tpu.memory_space<vmem>>, vector<8x32xf32>
    %c0_2 = arith.constant 0 : index
    %c0_3 = arith.constant 0 : index
    %4 = vector.load %arg1[%c0_2, %c0_3] : memref<1x32xf32, #tpu.memory_space<vmem>>, vector<1x32xf32>
    %cst = arith.constant dense<0.000000e+00> : vector<1x8xf32>
    %5 = tpu.matmul %4, %3, %cst {dimension_numbers = #tpu.dot_dimension_numbers<[1], [1], [0], [0], [0, 0, 1, 0], [], []>} : vector<1x32xf32>, vector<8x32xf32>, vector<1x8xf32> -> vector<1x8xf32>
    %c0_4 = arith.constant 0 : index
    %c0_5 = arith.constant 0 : index
    %6 = vector.load %arg5[%c0_4, %c0_5] : memref<1x1xf32, #tpu.memory_space<vmem>>, vector<1x1xf32>
    %cst_6 = arith.constant dense<0xFF800000> : vector<1xf32>
    %7 = vector.multi_reduction <maximumf>, %5, %cst_6 [1] : vector<1x8xf32> to vector<1xf32>
    %8 = vector.shape_cast %7 : vector<1xf32> to vector<1x1xf32>
    %9 = arith.maximumf %6, %8 : vector<1x1xf32>
    %10 = arith.subf %6, %9 : vector<1x1xf32>
    %11 = math.exp %10 : vector<1x1xf32>
    %12 = vector.broadcast %9 : vector<1x1xf32> to vector<1x8xf32>
    %13 = arith.subf %5, %12 : vector<1x8xf32>
    %14 = math.exp %13 : vector<1x8xf32>
    %c0_7 = arith.constant 0 : index
    %c0_8 = arith.constant 0 : index
    %15 = vector.load %arg6[%c0_7, %c0_8] : memref<1x1xf32, #tpu.memory_space<vmem>>, vector<1x1xf32>
    %16 = arith.mulf %11, %15 : vector<1x1xf32>
    %cst_9 = arith.constant dense<0.000000e+00> : vector<1xf32>
    %17 = vector.multi_reduction <add>, %14, %cst_9 [1] : vector<1x8xf32> to vector<1xf32>
    %18 = vector.shape_cast %17 : vector<1xf32> to vector<1x1xf32>
    %19 = arith.addf %16, %18 : vector<1x1xf32>
    %c0_10 = arith.constant 0 : index
    %c0_11 = arith.constant 0 : index
    %20 = vector.load %arg6[%c0_10, %c0_11] : memref<1x1xf32, #tpu.memory_space<vmem>>, vector<1x1xf32>
    tpu.vector_store %arg6[%c0_10, %c0_11], %19 {strides = array<i32>} : memref<1x1xf32, #tpu.memory_space<vmem>>, vector<1x1xf32>,
    %c0_12 = arith.constant 0 : index
    %c0_13 = arith.constant 0 : index
    %21 = vector.load %arg5[%c0_12, %c0_13] : memref<1x1xf32, #tpu.memory_space<vmem>>, vector<1x1xf32>
    tpu.vector_store %arg5[%c0_12, %c0_13], %9 {strides = array<i32>} : memref<1x1xf32, #tpu.memory_space<vmem>>, vector<1x1xf32>,
    %c0_14 = arith.constant 0 : index
    %c0_15 = arith.constant 0 : index
    %22 = vector.load %arg4[%c0_14, %c0_15] : memref<1x32xf32, #tpu.memory_space<vmem>>, vector<1x32xf32>
    %23 = vector.broadcast %11 : vector<1x1xf32> to vector<1x32xf32>
    %24 = arith.mulf %23, %22 : vector<1x32xf32>
    %cst_16 = arith.constant dense<0.000000e+00> : vector<1x32xf32>
    %25 = tpu.matmul %14, %3, %cst_16 {dimension_numbers = #tpu.dot_dimension_numbers<[1], [0], [0], [1], [0, 0, 1, 1], [], []>} : vector<1x8xf32>, vector<8x32xf32>, vector<1x32xf32> -> vector<1x32xf32>
    %26 = arith.addf %24, %25 : vector<1x32xf32>
    %c0_17 = arith.constant 0 : index
    %c0_18 = arith.constant 0 : index
    %27 = vector.load %arg4[%c0_17, %c0_18] : memref<1x32xf32, #tpu.memory_space<vmem>>, vector<1x32xf32>
    tpu.vector_store %arg4[%c0_17, %c0_18], %26 {strides = array<i32>} : memref<1x32xf32, #tpu.memory_space<vmem>>, vector<1x32xf32>,
    %c0_19 = arith.constant 0 : index
    %c0_20 = arith.constant 0 : index
    %28 = vector.load %arg3[%c0_19, %c0_20] : memref<1x8xf32, #tpu.memory_space<vmem>>, vector<1x8xf32>
    tpu.vector_store %arg3[%c0_19, %c0_20], %5 {strides = array<i32>} : memref<1x8xf32, #tpu.memory_space<vmem>>, vector<1x8xf32>,
    %c0_i32_21 = arith.constant 0 : i32
    %29 = arith.cmpi eq, %arg0, %c0_i32_21 : i32
    %30 = arith.extui %29 : i1 to i32
    %c0_i32_22 = arith.constant 0 : i32
    %31 = arith.cmpi ne, %30, %c0_i32_22 : i32
    scf.if %31 {
      %c0_23 = arith.constant 0 : index
      %c0_24 = arith.constant 0 : index
      %32 = vector.load %arg4[%c0_23, %c0_24] : memref<1x32xf32, #tpu.memory_space<vmem>>, vector<1x32xf32>
      %c0_25 = arith.constant 0 : index
      %c0_26 = arith.constant 0 : index
      %33 = vector.load %arg6[%c0_25, %c0_26] : memref<1x1xf32, #tpu.memory_space<vmem>>, vector<1x1xf32>
      %34 = vector.broadcast %33 : vector<1x1xf32> to vector<1x32xf32>
      %35 = arith.divf %32, %34 : vector<1x32xf32>
      %c0_27 = arith.constant 0 : index
      %c0_28 = arith.constant 0 : index
      %36 = vector.load %arg4[%c0_27, %c0_28] : memref<1x32xf32, #tpu.memory_space<vmem>>, vector<1x32xf32>
      tpu.vector_store %arg4[%c0_27, %c0_28], %35 {strides = array<i32>} : memref<1x32xf32, #tpu.memory_space<vmem>>, vector<1x32xf32>,
    } else {
    }
    return
  }
  func.func @transform_0(%arg0: i32) -> (i32, i32) {
    %c0_i32 = arith.constant 0 : i32
    %c0_i32_0 = arith.constant 0 : i32
    %c0_i32_1 = arith.constant 0 : i32
    return %c0_i32, %c0_i32_0 : i32, i32
  }
  func.func @transform_1(%arg0: i32) -> (i32, i32) {
    %c0_i32 = arith.constant 0 : i32
    %c0_i32_0 = arith.constant 0 : i32
    return %arg0, %c0_i32 : i32, i32
  }
  func.func @transform_2(%arg0: i32) -> (i32, i32) {
    %c0_i32 = arith.constant 0 : i32
    %c0_i32_0 = arith.constant 0 : i32
    return %c0_i32, %arg0 : i32, i32
  }
  func.func @transform_3(%arg0: i32) -> (i32, i32) {
    %c0_i32 = arith.constant 0 : i32
    %c0_i32_0 = arith.constant 0 : i32
    %c0_i32_1 = arith.constant 0 : i32
    return %c0_i32, %c0_i32_0 : i32, i32
  }
}

</mosaic_0001>

<bundles_post_ra>
// kernel: tpu_custom_call.1
= control target key start
LH: loop header
LB: loop body
LE: loop exit
PB: predicated region body
PF: predicated region fallthrough
CT: control target
= control target key end

     0   :  { %9 = vsyncpa [#allocation5], 0  ;;  %s377_s0 = inlined_call_operand.hbm [shape: f32[1,32], index: 0, kind: input, shape index: {}]   ;;  %s378_s1 = inlined_call_operand.hbm [shape: f32[8,32], index: 1, kind: input, shape index: {}]   ;;  %s379_s2 = inlined_call_operand.hbm [shape: f32[1,8], index: 2, kind: output, shape index: {0}]   ;;  %s380_s3 = inlined_call_operand.hbm [shape: f32[1,32], index: 3, kind: output, shape index: {1}]  }
   0x1   :  { %10 = vsyncpa [#allocation8], 0 }
   0x2   :  { %11 = vsyncpa [#allocation6], 0 }
   0x3   :  { %12 = vsyncpa [#allocation11], 0  ;;  %s18_s14 = sshll.u32 %s377_s0, 4  ;;  %s328_s15 = smov [#allocation4]   ;;  %s19_s14 = int_to_ptr.hbm [resolvable:$true] %s18_s14 }
   0x4   :  { %s20_s16 = sshll.u32 %s328_s15, 4  ;;  %s29_s19 = sshll.u32 %s378_s1, 4  ;;  %s21_s16 = int_to_ptr.vmem [resolvable:$true] %s20_s16  ;;  %s30_s19 = int_to_ptr.hbm [resolvable:$true] %s29_s19 }
   0x5   :  { %23 = dma.hbm_to_vmem [thread:$0]  %s19_s14, 16, %s21_s16, [#allocation5]  }
   0x6   :  { %s329_s20 = smov [#allocation7]  }
   0x7   :  { %s31_s21 = sshll.u32 %s329_s20, 4  ;;  %s32_s21 = int_to_ptr.vmem [resolvable:$true] %s31_s21 }
   0x8   :  { %34 = dma.hbm_to_vmem [thread:$0]  %s30_s19, 128, %s32_s21, [#allocation8]  }
   0x9   :  { %320 = dma.done.wait [#allocation5], 16  }
   0xa   :  { %321 = vsyncadd [#allocation5], 4294967280 }
   0xb   :  { %322 = dma.done.wait [#allocation8], 128  }
   0xc   :  { %323 = vsyncadd [#allocation8], 4294967168  ;;  %vm54_vm0 = vcmask 261120   ;;  %v52_v0 = vld [vmem:[#allocation7] sm:$0xff]  ;;  %v53_v1 = vld [vmem:[#allocation4] sm:$0x1] }
   0xd   :  { %205 = vmatpush.xpose.msk.msra.mxu0 %vm54_vm0, %v52_v0  ;;  %135 = vmatpush.msra.mxu1 %v52_v0  ;;  %vm47_vm1 = vcmask 0   ;;  %v330_v2 = vmov -1e+30   ;;  %vm82_vm2 = vcmask 57344   ;;  %v331_v5 = vmov 0   ;;  %s178_s22 = sshll.u32 %s379_s2, 4  ;;  %s179_s22 = int_to_ptr.hbm [resolvable:$true] %s178_s22 }
   0xe   :  { %48 = vst.msk [vmem:[#allocation2] sm:$0x1] %vm47_vm1, %v330_v2  ;;  %215 = vset.pattern.permute.xlu0 %v331_v5  ;;  %217 = vset.pattern.permute.xlu2 %v331_v5  ;;  %v332_v6 = vmov 0.0   ;;  %vm50_vm3 = vcmask 253952   ;;  %vm116_vm4 = vcmask 64512   ;;  %s333_s23 = smov [#allocation9]  }
   0xf   :  { %216 = vset.pattern.permute.xlu1 %v331_v5  ;;  %49 = vst.msk [vmem:[#allocation3] sm:$0x1] %vm47_vm1, %v332_v6  ;;  %s176_s24 = sshll.u32 %s333_s23, 4  ;;  %s334_s2 = smov [#allocation10]   ;;  %s177_s24 = int_to_ptr.vmem [resolvable:$true] %s176_s24 }
  0x10   :  { %206 = vmatmul.msk.f32.vlgmr.msra.gmra.mxu0 %vm54_vm0, %v53_v1  ;;  %51 = vst.msk [vmem:[#allocation10] sm:$0x1] %vm50_vm3, %v332_v6  ;;  %s187_s25 = sshll.u32 %s334_s2, 4  ;;  %s189_s28 = sshll.u32 %s380_s3, 4  ;;  %s188_s25 = int_to_ptr.vmem [resolvable:$true] %s187_s25  ;;  %s190_s28 = int_to_ptr.hbm [resolvable:$true] %s189_s28 }
  0x15   :  { %v81_v7 = vld [vmem:[#allocation2] sm:$0x1] }
  0x16   :  { %v99_v19 = vld [vmem:[#allocation3] sm:$0x1] }
  0x17   :  { %v108_v25 = vld [vmem:[#allocation10] sm:$0x1] }
  0x8d   :  { %v78_v3 = vpop.f32.mrf.mxu0 }
  0x8e   :  { %143 = vst.msk [vmem:[#allocation9] sm:$0x1] %vm82_vm2, %v78_v3  ;;  %v83_v4 = vsel %vm82_vm2, %v78_v3, -inf }
  0x8f   :  { %84 = vmax.xlane.f32.xlu0 %v83_v4  ;;  %181 = dma.vmem_to_hbm [thread:$0]  %s177_s24, 16, %s179_s22, [#allocation6]  }
 0x102   :  { %v85_v8 = vpop.xlane.xlu0 %84 }
 0x103   :  { %v86_v9 = vmax.f32 %v81_v7, %v85_v8 }
 0x105   :  { %v87_v10 = vsub.f32 %v81_v7, %v86_v9  ;;  %107 = vst.msk [vmem:[#allocation2] sm:$0x1] %vm47_vm1, %v86_v9  ;;  %92 = vperm.xlu0 %215, %v86_v9  }
 0x107   :  { %v88_v11 = vmul.f32 1.442695, %v87_v10 }
 0x109   :  { %218 = vpow2.f32 %v88_v11 }
 0x10f   :  { %v219_v12 = vpop.eup %218 }
 0x110   :  { %111 = vperm.xlu2 %217, %v219_v12   ;;  %v100_v20 = vmul.f32 %v219_v12, %v99_v19 }
 0x16a   :  { %v112_v22 = vpop.permute.xlu2 %111 }
 0x16b   :  { %v114_v24 = vperm.slane %v112_v22, 0 }
 0x16d   :  { %v115_v26 = vmul.f32 %v114_v24, %v108_v25 }
 0x177   :  { %v93_v13 = vpop.permute.xlu0 %92 }
 0x178   :  { %v95_v14 = vperm.slane %v93_v13, 0 }
 0x17a   :  { %v96_v15 = vsub.f32 %v78_v3, %v95_v14 }
 0x17c   :  { %v97_v16 = vmul.f32 1.442695, %v96_v15 }
 0x17e   :  { %220 = vpow2.f32 %v97_v16 }
 0x184   :  { %v221_v17 = vpop.eup %220 }
 0x185   :  { %207 = vmatmul.msk.f32.vlgmr.msra.gmra.mxu1 %vm116_vm4, %v221_v17  ;;  %v101_v18 = vsel %vm82_vm2, %v221_v17, 0.0 }
 0x186   :  { %102 = vadd.xlane.f32.xlu1 %v101_v18 }
 0x1f9   :  { %v103_v21 = vpop.xlane.xlu1 %102 }
 0x1fa   :  { %v104_v23 = vadd.f32 %v103_v21, %v100_v20 }
 0x1fc   :  { %106 = vst.msk [vmem:[#allocation3] sm:$0x1] %vm47_vm1, %v104_v23 }
 0x202   :  { %v137_v27 = vpop.f32.mrf.mxu1 }
 0x203   :  { %v140_v28 = vadd.f32 %v137_v27, %v115_v26  ;;  %v148_v29 = vld [vmem:[#allocation3] sm:$0x1] }
 0x204   :  { %151 = vperm.xlu1 %216, %v148_v29  }
 0x205   :  { %142 = vst.msk [vmem:[#allocation10] sm:$0x1] %vm50_vm3, %v140_v28 }
 0x20c   :  { %v147_v41 = vld [vmem:[#allocation10] sm:$0x1] }
 0x276   :  { %v152_v30 = vpop.permute.xlu1 %151 }
 0x277   :  { %v154_v31 = vperm.slane %v152_v30, 0 }
 0x279   :  { %222 = vrcp.f32 %v154_v31  ;;  %v166_v35 = vand.u32 2147483648, %v154_v31  ;;  %v164_v37 = vand.u32 2147483647, %v154_v31  ;;  %vm160_vm6 = vweird.f32 %v154_v31 }
 0x27b   :  { %v167_v39 = vor.u32 1.1754944e-38, %v166_v35  ;;  %vm165_vm8 = vcmp.eq.f32.partialorder %v164_v37, 8.507059e+37 }
 0x27f   :  { %v223_v32 = vpop.eup %222 }
 0x280   :  { %v156_v33 = vmul.f32 %v223_v32, %v154_v31  ;;  %vm161_vm5 = vweird.f32 %v223_v32 }
 0x281   :  { %vm162_vm7 = vmor %vm160_vm6, %vm161_vm5 }
 0x282   :  { %v157_v34 = vsub.f32 1.0, %v156_v33 }
 0x284   :  { %v158_v36 = vmul.f32 %v223_v32, %v157_v34 }
 0x286   :  { %v159_v38 = vadd.f32 %v223_v32, %v158_v36 }
 0x288   :  { %v163_v40 = vsel %vm162_vm7, %v223_v32, %v159_v38 }
 0x289   :  { %v168_v42 = vsel %vm165_vm8, %v167_v39, %v163_v40 }
 0x28a   :  { %v169_v43 = vmul.f32 %v168_v42, %v147_v41 }
 0x28c   :  { %170 = vst.msk [vmem:[#allocation10] sm:$0x1] %vm50_vm3, %v169_v43 }
 0x28d   :  { %192 = dma.vmem_to_hbm [thread:$0]  %s188_s25, 16, %s190_s28, [#allocation11]  }
 0x28e   :  { %324 = dma.done.wait [#allocation6], 16  }
 0x28f   :  { %325 = vsyncadd [#allocation6], 4294967280 }
 0x290   :  { %326 = dma.done.wait [#allocation11], 16  }
 0x291   :  { %327 = vsyncadd [#allocation11], 4294967280 }
 0x292   :  { %201 = vsyncpa [#allocation5], 1 }
 0x293   :  { %202 = vsyncpa [#allocation8], 1 }
 0x294   :  { %203 = vsyncpa [#allocation6], 1 }
 0x295   :  { %204 = vsyncpa [#allocation11], 1 }

</bundles_post_ra>
